<compile_context>
chip_gen: v5e
topology: v5e:2x2
jax: 0.10.0
libtpu: 0.0.40
codegen_flags: <defaults>
</compile_context>

<pallas_src>
import functools

import jax
import jax.numpy as jnp
from jax.experimental import pallas as pl
from jax.experimental.pallas import tpu as pltpu

LANE = 128  # fc2 output is padded to a multiple of this for a lane-dense store


def _mlp_kernel(x_ref, w1_ref, b1_ref, w2_ref, b2_ref, o_ref, *, softmax_output):
    # fc1: bf16 operands, f32 accumulation on the MXU.
    x = x_ref[...].astype(jnp.bfloat16)
    h = jnp.dot(x, w1_ref[...], preferred_element_type=jnp.float32)
    h = jnp.maximum(h + b1_ref[...], 0.0)  # bias + ReLU in f32 (VPU)
    # fc2 (output columns zero-padded to a lane multiple): bf16 operands, f32 accumulation.
    y = jnp.dot(h.astype(jnp.bfloat16), w2_ref[...], preferred_element_type=jnp.float32)
    # Padded-lane mask is pre-folded into b2 (-1e30) on the softmax path, so no iota/where here.
    y = y + b2_ref[...]
    if softmax_output:
        m = jnp.max(y, axis=-1, keepdims=True)
        e = jnp.exp(y - m)
        y = e / jnp.sum(e, axis=-1, keepdims=True)  # exact normalization (rows sum to 1)
    o_ref[...] = y.astype(o_ref.dtype)


def prepare_params(w1, b1, w2, b2, *, softmax_output):
    """One-time weight prep: cast matmul operands to bf16 and pad fc2 to a lane multiple.

    Cache the returned tuple across calls; do NOT redo this per forward invocation.
    w1: [in_dim, hidden], w2: [hidden, out_dim] (transposed vs. nn.Linear.weight),
    biases as [1, dim] rows, all f32.
    """
    out_dim = w2.shape[1]
    n_pad = pl.cdiv(out_dim, LANE) * LANE
    w1p = w1.astype(jnp.bfloat16)
    w2p = jnp.pad(w2, ((0, 0), (0, n_pad - out_dim))).astype(jnp.bfloat16)
    # Fold the softmax padding mask into the bias: padded lanes come out of the bias add at
    # -1e30 and vanish in exp(). Non-softmax path pads with 0 (padded lanes sliced off anyway).
    pad_val = -1e30 if softmax_output else 0.0
    b2p = jnp.pad(b2, ((0, 0), (0, n_pad - out_dim)), constant_values=pad_val)
    return w1p, b1, w2p, b2p, out_dim


def simple_mlp_forward(x, params, *, softmax_output, block_batch=1024):
    """x: [B, input_dim] f32; params from prepare_params(). Returns [B, output_dim] f32."""
    w1p, b1, w2p, b2p, out_dim = params
    B, in_dim = x.shape
    hidden = w1p.shape[1]
    n_pad = w2p.shape[1]

    # Batch tiling: collapse to a single grid step whenever B fits block_batch (the whole
    # problem is a few tens of KiB of VMEM), otherwise tile at block_batch rows. Keep the
    # sublane dimension a multiple of 8.
    bp = pl.cdiv(B, 8) * 8
    tb = min(block_batch, bp)
    bp = pl.cdiv(bp, tb) * tb
    x_p = jnp.pad(x, ((0, bp - B), (0, 0))) if bp != B else x
    grid_b = bp // tb

    kernel = functools.partial(_mlp_kernel, softmax_output=softmax_output)
    out = pl.pallas_call(
        kernel,
        out_shape=jax.ShapeDtypeStruct((bp, n_pad), jnp.float32),
        grid=(grid_b,),
        in_specs=[
            pl.BlockSpec((tb, in_dim), lambda i: (i, 0)),       # x: streamed per batch tile
            pl.BlockSpec((in_dim, hidden), lambda i: (0, 0)),   # weights/biases: VMEM-resident
            pl.BlockSpec((1, hidden), lambda i: (0, 0)),
            pl.BlockSpec((hidden, n_pad), lambda i: (0, 0)),
            pl.BlockSpec((1, n_pad), lambda i: (0, 0)),
        ],
        out_specs=pl.BlockSpec((tb, n_pad), lambda i: (i, 0)),
        compiler_params=pltpu.CompilerParams(
            # No megacore split for a single tiny tile; shard batch tiles only when they exist.
            dimension_semantics=("arbitrary",) if grid_b == 1 else ("parallel",)),
    )(x_p, w1p, b1, w2p, b2p)
    return out[:B, :out_dim]


def init_params(key, input_dim, hidden_dim, output_dim):
    # Deterministic init mimicking nn.Linear's U(-1/sqrt(fan_in), 1/sqrt(fan_in)).
    k1, k2, k3, k4 = jax.random.split(key, 4)
    lim1 = 1.0 / jnp.sqrt(jnp.float32(input_dim))
    lim2 = 1.0 / jnp.sqrt(jnp.float32(hidden_dim))
    w1 = jax.random.uniform(k1, (input_dim, hidden_dim), jnp.float32, -lim1, lim1)
    b1 = jax.random.uniform(k2, (1, hidden_dim), jnp.float32, -lim1, lim1)
    w2 = jax.random.uniform(k3, (hidden_dim, output_dim), jnp.float32, -lim2, lim2)
    b2 = jax.random.uniform(k4, (1, output_dim), jnp.float32, -lim2, lim2)
    return w1, b1, w2, b2


def reference_forward_f32(x, w1, b1, w2, b2, *, softmax_output):
    h = jnp.maximum(x @ w1 + b1, 0.0)
    y = h @ w2 + b2
    return jax.nn.softmax(y, axis=-1) if softmax_output else y


def reference_forward_matched(x, w1, b1, w2, b2, *, softmax_output):
    # dtype-matched reference: bf16 matmul operands, f32 accumulation, f32 epilogue.
    h = jnp.dot(x.astype(jnp.bfloat16), w1.astype(jnp.bfloat16),
                preferred_element_type=jnp.float32) + b1
    h = jnp.maximum(h, 0.0)
    y = jnp.dot(h.astype(jnp.bfloat16), w2.astype(jnp.bfloat16),
                preferred_element_type=jnp.float32) + b2
    return jax.nn.softmax(y, axis=-1) if softmax_output else y


if __name__ == "__main__":
    key = jax.random.PRNGKey(0)
    kx, kp = jax.random.split(key)

    batch, input_dim, hidden_dim, output_dim = 64, 16, 128, 8
    x = jax.random.normal(kx, (batch, input_dim), jnp.float32)
    w1, b1, w2, b2 = init_params(kp, input_dim, hidden_dim, output_dim)

    # Prepare (pad + cast) weights once, outside the per-call path.
    params_pi = prepare_params(w1, b1, w2, b2, softmax_output=True)
    params_v = prepare_params(w1, b1, w2, b2, softmax_output=False)

    # Policy head (softmax_output=True) and value-style head (softmax_output=False).
    out_pi = jax.block_until_ready(simple_mlp_forward(x, params_pi, softmax_output=True))
    out_v = jax.block_until_ready(simple_mlp_forward(x, params_v, softmax_output=False))

    assert out_pi.shape == (batch, output_dim)
    assert out_v.shape == (batch, output_dim)

    # Tight check against a dtype-matched (bf16-matmul) reference.
    ref_pi_m = reference_forward_matched(x, w1, b1, w2, b2, softmax_output=True)
    ref_v_m = reference_forward_matched(x, w1, b1, w2, b2, softmax_output=False)
    assert jnp.allclose(out_pi, ref_pi_m, atol=5e-3, rtol=5e-3)
    assert jnp.allclose(out_v, ref_v_m, atol=5e-3, rtol=5e-3)

    # Loose check against the pure-f32 (PyTorch-equivalent) reference; slack covers bf16 matmul.
    ref_pi_f = reference_forward_f32(x, w1, b1, w2, b2, softmax_output=True)
    ref_v_f = reference_forward_f32(x, w1, b1, w2, b2, softmax_output=False)
    assert jnp.allclose(out_pi, ref_pi_f, atol=5e-2, rtol=5e-2)
    assert jnp.allclose(out_v, ref_v_f, atol=5e-2, rtol=5e-2)

    # Softmax rows normalize to 1 (exact divide; padded lanes killed via the -1e30 bias fold).
    assert jnp.allclose(out_pi.sum(axis=-1), 1.0, atol=1e-3)

    print("KERNEL_OK")
</pallas_src>

<mosaic_0001>
module attributes {stable_mosaic.version = 11 : i64} {
  func.func @_mlp_kernel(%arg0: i32, %arg1: memref<64x16xf32, #tpu.memory_space<vmem>>, %arg2: memref<16x128xbf16, #tpu.memory_space<vmem>>, %arg3: memref<1x128xf32, #tpu.memory_space<vmem>>, %arg4: memref<128x128xbf16, #tpu.memory_space<vmem>>, %arg5: memref<1x128xf32, #tpu.memory_space<vmem>>, %arg6: memref<64x128xf32, #tpu.memory_space<vmem>>) attributes {dimension_semantics = [#tpu.dimension_semantics<arbitrary>], iteration_bounds = array<i64: 1>, scalar_prefetch = 0 : i64, scratch_operands = 0 : i64, tpu.core_type = #tpu.core_type<tc>, window_params = [{transform_indices = @transform_0, window_bounds = array<i64: 64, 16>}, {pipeline_mode = #tpu.pipeline_mode<synchronous>, transform_indices = @transform_1, window_bounds = array<i64: 16, 128>}, {pipeline_mode = #tpu.pipeline_mode<synchronous>, transform_indices = @transform_2, window_bounds = array<i64: 1, 128>}, {pipeline_mode = #tpu.pipeline_mode<synchronous>, transform_indices = @transform_3, window_bounds = array<i64: 128, 128>}, {pipeline_mode = #tpu.pipeline_mode<synchronous>, transform_indices = @transform_4, window_bounds = array<i64: 1, 128>}, {transform_indices = @transform_5, window_bounds = array<i64: 64, 128>}]} {
    %c0 = arith.constant 0 : index
    %c0_0 = arith.constant 0 : index
    %0 = vector.load %arg1[%c0, %c0_0] : memref<64x16xf32, #tpu.memory_space<vmem>>, vector<64x16xf32>
    %1 = arith.truncf %0 : vector<64x16xf32> to vector<64x16xbf16>
    %c0_1 = arith.constant 0 : index
    %c0_2 = arith.constant 0 : index
    %2 = vector.load %arg2[%c0_1, %c0_2] : memref<16x128xbf16, #tpu.memory_space<vmem>>, vector<16x128xbf16>
    %cst = arith.constant dense<0.000000e+00> : vector<64x128xf32>
    %3 = tpu.matmul %1, %2, %cst {dimension_numbers = #tpu.dot_dimension_numbers<[1], [0], [0], [1], [0, 0, 1, 1], [], []>} : vector<64x16xbf16>, vector<16x128xbf16>, vector<64x128xf32> -> vector<64x128xf32>
    %c0_3 = arith.constant 0 : index
    %c0_4 = arith.constant 0 : index
    %4 = vector.load %arg3[%c0_3, %c0_4] : memref<1x128xf32, #tpu.memory_space<vmem>>, vector<1x128xf32>
    %5 = vector.broadcast %4 : vector<1x128xf32> to vector<64x128xf32>
    %6 = arith.addf %3, %5 : vector<64x128xf32>
    %cst_5 = arith.constant 0.000000e+00 : f32
    %7 = vector.broadcast %cst_5 : f32 to vector<64x128xf32>
    %8 = arith.maximumf %6, %7 : vector<64x128xf32>
    %9 = arith.truncf %8 : vector<64x128xf32> to vector<64x128xbf16>
    %c0_6 = arith.constant 0 : index
    %c0_7 = arith.constant 0 : index
    %10 = vector.load %arg4[%c0_6, %c0_7] : memref<128x128xbf16, #tpu.memory_space<vmem>>, vector<128x128xbf16>
    %cst_8 = arith.constant dense<0.000000e+00> : vector<64x128xf32>
    %11 = tpu.matmul %9, %10, %cst_8 {dimension_numbers = #tpu.dot_dimension_numbers<[1], [0], [0], [1], [0, 0, 1, 1], [], []>} : vector<64x128xbf16>, vector<128x128xbf16>, vector<64x128xf32> -> vector<64x128xf32>
    %c0_9 = arith.constant 0 : index
    %c0_10 = arith.constant 0 : index
    %12 = vector.load %arg5[%c0_9, %c0_10] : memref<1x128xf32, #tpu.memory_space<vmem>>, vector<1x128xf32>
    %13 = vector.broadcast %12 : vector<1x128xf32> to vector<64x128xf32>
    %14 = arith.addf %11, %13 : vector<64x128xf32>
    %cst_11 = arith.constant dense<0xFF800000> : vector<64xf32>
    %15 = vector.multi_reduction <maximumf>, %14, %cst_11 [1] : vector<64x128xf32> to vector<64xf32>
    %16 = vector.shape_cast %15 : vector<64xf32> to vector<64x1xf32>
    %17 = vector.broadcast %16 : vector<64x1xf32> to vector<64x128xf32>
    %18 = arith.subf %14, %17 : vector<64x128xf32>
    %19 = math.exp %18 : vector<64x128xf32>
    %cst_12 = arith.constant dense<0.000000e+00> : vector<64xf32>
    %20 = vector.multi_reduction <add>, %19, %cst_12 [1] : vector<64x128xf32> to vector<64xf32>
    %21 = vector.shape_cast %20 : vector<64xf32> to vector<64x1xf32>
    %22 = vector.broadcast %21 : vector<64x1xf32> to vector<64x128xf32>
    %23 = arith.divf %19, %22 : vector<64x128xf32>
    %c0_13 = arith.constant 0 : index
    %c0_14 = arith.constant 0 : index
    %24 = vector.load %arg6[%c0_13, %c0_14] : memref<64x128xf32, #tpu.memory_space<vmem>>, vector<64x128xf32>
    tpu.vector_store %arg6[%c0_13, %c0_14], %23 {strides = array<i32>} : memref<64x128xf32, #tpu.memory_space<vmem>>, vector<64x128xf32>,
    return
  }
  func.func @transform_0(%arg0: i32) -> (i32, i32) {
    %c0_i32 = arith.constant 0 : i32
    %c0_i32_0 = arith.constant 0 : i32
    return %arg0, %c0_i32 : i32, i32
  }
  func.func @transform_1(%arg0: i32) -> (i32, i32) {
    %c0_i32 = arith.constant 0 : i32
    %c0_i32_0 = arith.constant 0 : i32
    %c0_i32_1 = arith.constant 0 : i32
    return %c0_i32, %c0_i32_0 : i32, i32
  }
  func.func @transform_2(%arg0: i32) -> (i32, i32) {
    %c0_i32 = arith.constant 0 : i32
    %c0_i32_0 = arith.constant 0 : i32
    %c0_i32_1 = arith.constant 0 : i32
    return %c0_i32, %c0_i32_0 : i32, i32
  }
  func.func @transform_3(%arg0: i32) -> (i32, i32) {
    %c0_i32 = arith.constant 0 : i32
    %c0_i32_0 = arith.constant 0 : i32
    %c0_i32_1 = arith.constant 0 : i32
    return %c0_i32, %c0_i32_0 : i32, i32
  }
  func.func @transform_4(%arg0: i32) -> (i32, i32) {
    %c0_i32 = arith.constant 0 : i32
    %c0_i32_0 = arith.constant 0 : i32
    %c0_i32_1 = arith.constant 0 : i32
    return %c0_i32, %c0_i32_0 : i32, i32
  }
  func.func @transform_5(%arg0: i32) -> (i32, i32) {
    %c0_i32 = arith.constant 0 : i32
    %c0_i32_0 = arith.constant 0 : i32
    return %arg0, %c0_i32 : i32, i32
  }
}

</mosaic_0001>

<bundles_post_ra>
// kernel: tpu_custom_call.1
= control target key start
LH: loop header
LB: loop body
LE: loop exit
PB: predicated region body
PF: predicated region fallthrough
CT: control target
= control target key end

     0   :  { %vm46_vm0 = vcmask 130048   ;;  %s657_s0 = inlined_call_operand.vmem [shape: f32[64,16], index: 0, kind: input, shape index: {}]   ;;  %s658_s1 = inlined_call_operand.vmem [shape: bf16[16,128], index: 1, kind: input, shape index: {}]   ;;  %s659_s2 = inlined_call_operand.vmem [shape: f32[1,128], index: 2, kind: input, shape index: {}]   ;;  %s660_s3 = inlined_call_operand.vmem [shape: bf16[128,128], index: 3, kind: input, shape index: {}]   ;;  %s661_s4 = inlined_call_operand.vmem [shape: f32[1,128], index: 4, kind: input, shape index: {}]   ;;  %s662_s5 = inlined_call_operand.hbm [shape: f32[64,128], index: 5, kind: output, shape index: {}]  }
   0x1   :  { %v439_v0 = vld [vmem:[%s658_s1] sm:$0xff]  ;;  %v23_v2 = vld [vmem:[%s657_s0 + $0x8] sm:$0xff]  ;;  %v24_v4 = vld [vmem:[%s657_s0 + $0x10] sm:$0xff] }
   0x2   :  { %v22_v1 = vld [vmem:[%s657_s0] sm:$0xff]  ;;  %v25_v5 = vld [vmem:[%s657_s0 + $0x18] sm:$0xff]  ;;  %66 = vmatpush.bf16.msra.mxu0 %v439_v0  ;;  %448 = vmatpush.bf16.msra.mxu3 %v439_v0 }
   0x3   :  { %v30_v3 = vpack.c.bf16 %v23_v2, %v22_v1  ;;  %v31_v6 = vpack.c.bf16 %v25_v5, %v24_v4 }
   0x4   :  { %10 = vsyncpa [#allocation3], 0  ;;  %v447_v7 = vld [vmem:[%s660_s3 + $0x38] sm:$0xff]  ;;  %v446_v8 = vld [vmem:[%s660_s3 + $0x30] sm:$0xff]  ;;  %s387_s29 = sshll.u32 %s662_s5, 4  ;;  %s529_s30 = smov 128   ;;  %s388_s29 = int_to_ptr.hbm [resolvable:$true] %s387_s29 }
   0x5   :  { %403 = vmatmul.msk.bf16.vlgmr.msra.gmra.mxu0 %vm46_vm0, %v30_v3  ;;  %404 = vmatmul.msk.bf16.vlgmr.msra.gmra.mxu3 %vm46_vm0, %v31_v6  ;;  %v445_v9 = vld [vmem:[%s660_s3 + $0x28] sm:$0xff]  ;;  %v26_v10 = vld [vmem:[%s657_s0 + $0x20] sm:$0xff]  ;;  %v28_v14 = vld [vmem:[%s657_s0 + $0x30] sm:$0xff]  ;;  %s530_s6 = smov 8  }
   0x6   :  { %168 = vmatpush.bf16.msrb.mxu0 %v447_v7  ;;  %449 = vmatpush.bf16.msra.mxu1 %v447_v7  ;;  %v27_v11 = vld [vmem:[%s657_s0 + $0x28] sm:$0xff]  ;;  %v444_v12 = vld [vmem:[%s660_s3 + $0x20] sm:$0xff]  ;;  %v29_v15 = vld [vmem:[%s657_s0 + $0x38] sm:$0xff] }
   0x7   :  { %450 = vmatpush.bf16.msra.mxu2 %v447_v7  ;;  %v32_v13 = vpack.c.bf16 %v27_v11, %v26_v10  ;;  %v33_v16 = vpack.c.bf16 %v29_v15, %v28_v14  ;;  %v443_v17 = vld [vmem:[%s660_s3 + $0x18] sm:$0xff]  ;;  %v442_v18 = vld [vmem:[%s660_s3 + $0x10] sm:$0xff]  ;;  %v441_v19 = vld [vmem:[%s660_s3 + $0x8] sm:$0xff] }
   0x8   :  { %v440_v20 = vld [vmem:[%s660_s3] sm:$0xff] }
   0x9   :  { %v468_v22 = vld [vmem:[%s659_s2] ss:$0 sm:$0xff] }
   0xa   :  { %169 = vmatpush.bf16.msrb.mxu0 %v446_v8  ;;  %451 = vmatpush.bf16.msra.mxu1 %v446_v8  ;;  %v469_v50 = vld [vmem:[%s661_s4] ss:$0 sm:$0xff]  ;;  %s528_s4 = smov [#allocation2]  }
   0xb   :  { %452 = vmatpush.bf16.msra.mxu2 %v446_v8  ;;  %s385_s27 = sshll.u32 %s528_s4, 4  ;;  %s386_s27 = int_to_ptr.vmem [resolvable:$true] %s385_s27 }
   0xe   :  { %170 = vmatpush.bf16.msrb.mxu0 %v445_v9  ;;  %453 = vmatpush.bf16.msra.mxu1 %v445_v9 }
   0xf   :  { %454 = vmatpush.bf16.msra.mxu2 %v445_v9 }
  0x12   :  { %171 = vmatpush.bf16.msrb.mxu0 %v444_v12  ;;  %455 = vmatpush.bf16.msra.mxu1 %v444_v12 }
  0x13   :  { %456 = vmatpush.bf16.msra.mxu2 %v444_v12 }
  0x15   :  { %405 = vmatmul.msk.bf16.gmra.mxu3 %vm46_vm0, %v32_v13 }
  0x16   :  { %172 = vmatpush.bf16.msrb.mxu0 %v443_v17  ;;  %457 = vmatpush.bf16.msra.mxu1 %v443_v17 }
  0x17   :  { %458 = vmatpush.bf16.msra.mxu2 %v443_v17 }
  0x1a   :  { %173 = vmatpush.bf16.msrb.mxu0 %v442_v18  ;;  %459 = vmatpush.bf16.msra.mxu1 %v442_v18 }
  0x1b   :  { %460 = vmatpush.bf16.msra.mxu2 %v442_v18 }
  0x1e   :  { %174 = vmatpush.bf16.msrb.mxu0 %v441_v19  ;;  %461 = vmatpush.bf16.msra.mxu1 %v441_v19 }
  0x1f   :  { %462 = vmatpush.bf16.msra.mxu2 %v441_v19 }
  0x22   :  { %175 = vmatpush.bf16.msrb.mxu0 %v440_v20  ;;  %463 = vmatpush.bf16.msra.mxu1 %v440_v20 }
  0x23   :  { %464 = vmatpush.bf16.msra.mxu2 %v440_v20 }
  0x25   :  { %406 = vmatmul.msk.bf16.gmra.mxu3 %vm46_vm0, %v33_v16 }
  0x82   :  { %v68_v21 = vpop.f32.mrf.mxu0 }
  0x83   :  { %v69_v23 = vadd.f32 %v468_v22, %v68_v21 }
  0x85   :  { %v88_v26 = vmax.f32 %v69_v23, 0.0 }
  0x88   :  { %v73_v24 = vpop.f32.mrf.mxu3 }
  0x89   :  { %v74_v29 = vadd.f32 %v468_v22, %v73_v24 }
  0x8a   :  { %v70_v25 = vpop.f32.mrf.mxu0 }
  0x8b   :  { %v71_v27 = vadd.f32 %v468_v22, %v70_v25  ;;  %v90_v33 = vmax.f32 %v74_v29, 0.0 }
  0x8d   :  { %v89_v28 = vmax.f32 %v71_v27, 0.0 }
  0x8f   :  { %v96_v30 = vpack.c.bf16 %v89_v28, %v88_v26 }
  0x90   :  { %v75_v31 = vpop.f32.mrf.mxu3 }
  0x91   :  { %v76_v32 = vadd.f32 %v468_v22, %v75_v31  ;;  %176 = vmatmul.bf16.vlgmr.msrb.gmra.mxu0 %v96_v30 }
  0x93   :  { %v91_v34 = vmax.f32 %v76_v32, 0.0 }
  0x95   :  { %v97_v35 = vpack.c.bf16 %v91_v34, %v90_v33 }
  0x97   :  { %181 = vmatmul.bf16.vlgmr.msra.gmra.mxu1 %v97_v35 }
  0x98   :  { %v78_v36 = vpop.f32.mrf.mxu3 }
  0x99   :  { %v79_v37 = vadd.f32 %v468_v22, %v78_v36 }
  0x9b   :  { %v92_v40 = vmax.f32 %v79_v37, 0.0 }
  0xa0   :  { %v80_v38 = vpop.f32.mrf.mxu3 }
  0xa1   :  { %v81_v39 = vadd.f32 %v468_v22, %v80_v38 }
  0xa3   :  { %v93_v41 = vmax.f32 %v81_v39, 0.0 }
  0xa5   :  { %v98_v42 = vpack.c.bf16 %v93_v41, %v92_v40 }
  0xa7   :  { %186 = vmatmul.bf16.vlgmr.msra.gmra.mxu2 %v98_v42 }
  0xa8   :  { %v83_v43 = vpop.f32.mrf.mxu3 }
  0xa9   :  { %v84_v44 = vadd.f32 %v468_v22, %v83_v43 }
  0xab   :  { %v94_v47 = vmax.f32 %v84_v44, 0.0 }
  0xb0   :  { %v85_v45 = vpop.f32.mrf.mxu3 }
  0xb1   :  { %v86_v46 = vadd.f32 %v468_v22, %v85_v45 }
  0xb3   :  { %v95_v48 = vmax.f32 %v86_v46, 0.0 }
  0xb5   :  { %v99_v49 = vpack.c.bf16 %v95_v48, %v94_v47 }
  0xb7   :  { %191 = vmatmul.bf16.gmra.mxu2 %v99_v49 }
 0x10e   :  { %v177_v51 = vpop.f32.mrf.mxu0 }
 0x10f   :  { %v178_v52 = vadd.f32 %v469_v50, %v177_v51 }
 0x111   :  { %197 = vmax.xlane.f32.xlu0 %v178_v52 }
 0x114   :  { %v182_v53 = vpop.f32.mrf.mxu1 }
 0x115   :  { %v183_v54 = vadd.f32 %v469_v50, %v182_v53 }
 0x116   :  { %v179_v55 = vpop.f32.mrf.mxu0 }
 0x117   :  { %v180_v56 = vadd.f32 %v469_v50, %v179_v55  ;;  %201 = vmax.xlane.f32.xlu1 %v183_v54 }
 0x119   :  { %199 = vmax.xlane.f32.xlu0 %v180_v56 }
 0x11c   :  { %v184_v57 = vpop.f32.mrf.mxu1 }
 0x11d   :  { %v185_v58 = vadd.f32 %v469_v50, %v184_v57 }
 0x11f   :  { %203 = vmax.xlane.f32.xlu1 %v185_v58 }
 0x12a   :  { %v187_v59 = vpop.f32.mrf.mxu2 }
 0x12b   :  { %v188_v60 = vadd.f32 %v469_v50, %v187_v59 }
 0x12d   :  { %205 = vmax.xlane.f32.xlu2 %v188_v60 }
 0x132   :  { %v189_v61 = vpop.f32.mrf.mxu2 }
 0x133   :  { %v190_v62 = vadd.f32 %v469_v50, %v189_v61 }
 0x135   :  { %207 = vmax.xlane.f32.xlu2 %v190_v62 }
 0x13a   :  { %v192_v63 = vpop.f32.mrf.mxu2 }
 0x13b   :  { %v193_v0 = vadd.f32 %v469_v50, %v192_v63 }
 0x13d   :  { %209 = vmax.xlane.f32.xlu0 %v193_v0 }
 0x142   :  { %v194_v1 = vpop.f32.mrf.mxu2 }
 0x143   :  { %v195_v2 = vadd.f32 %v469_v50, %v194_v1 }
 0x145   :  { %211 = vmax.xlane.f32.xlu1 %v195_v2 }
 0x184   :  { %v198_v3 = vpop.xlane.xlu0 %197 }
 0x185   :  { %v213_v4 = vsub.f32 %v178_v52, %v198_v3 }
 0x187   :  { %v221_v5 = vmul.f32 1.442695, %v213_v4 }
 0x189   :  { %470 = vpow2.f32 %v221_v5 }
 0x18a   :  { %v202_v6 = vpop.xlane.xlu1 %201 }
 0x18b   :  { %v215_v7 = vsub.f32 %v183_v54, %v202_v6 }
 0x18c   :  { %v200_v8 = vpop.xlane.xlu0 %199 }
 0x18d   :  { %v225_v9 = vmul.f32 1.442695, %v215_v7  ;;  %v214_v10 = vsub.f32 %v180_v56, %v200_v8 }
 0x18f   :  { %v622_v11 = vpop.eup %470  ;;  %472 = vpow2.f32 %v225_v9  ;;  %v223_v12 = vmul.f32 1.442695, %v214_v10 }
 0x190   :  { %237 = vadd.xlane.f32.xlu2 %v622_v11 }
 0x191   :  { %474 = vpow2.f32 %v223_v12 }
 0x192   :  { %v204_v13 = vpop.xlane.xlu1 %203 }
 0x193   :  { %v216_v14 = vsub.f32 %v185_v58, %v204_v13 }
 0x195   :  { %v625_v15 = vpop.eup %472  ;;  %v227_v16 = vmul.f32 1.442695, %v216_v14 }
 0x196   :  { %241 = vadd.xlane.f32.xlu1 %v625_v15 }
 0x197   :  { %v628_v17 = vpop.eup %474  ;;  %476 = vpow2.f32 %v227_v16 }
 0x198   :  { %239 = vadd.xlane.f32.xlu0 %v628_v17 }
 0x19d   :  { %v631_v18 = vpop.eup %476 }
 0x19e   :  { %243 = vadd.xlane.f32.xlu2 %v631_v18 }
 0x1a0   :  { %v206_v19 = vpop.xlane.xlu2 %205 }
 0x1a1   :  { %v217_v20 = vsub.f32 %v188_v60, %v206_v19 }
 0x1a3   :  { %v229_v21 = vmul.f32 1.442695, %v217_v20 }
 0x1a5   :  { %478 = vpow2.f32 %v229_v21 }
 0x1a8   :  { %v208_v22 = vpop.xlane.xlu2 %207 }
 0x1a9   :  { %v218_v23 = vsub.f32 %v190_v62, %v208_v22 }
 0x1ab   :  { %v634_v24 = vpop.eup %478  ;;  %v231_v25 = vmul.f32 1.442695, %v218_v23 }
 0x1ac   :  { %245 = vadd.xlane.f32.xlu0 %v634_v24 }
 0x1ad   :  { %480 = vpow2.f32 %v231_v25 }
 0x1b0   :  { %v210_v26 = vpop.xlane.xlu0 %209 }
 0x1b1   :  { %v219_v27 = vsub.f32 %v193_v0, %v210_v26 }
 0x1b3   :  { %v637_v28 = vpop.eup %480  ;;  %v233_v29 = vmul.f32 1.442695, %v219_v27 }
 0x1b4   :  { %247 = vadd.xlane.f32.xlu1 %v637_v28 }
 0x1b5   :  { %482 = vpow2.f32 %v233_v29 }
 0x1b8   :  { %v212_v30 = vpop.xlane.xlu1 %211 }
 0x1b9   :  { %v220_v31 = vsub.f32 %v195_v2, %v212_v30 }
 0x1bb   :  { %v640_v32 = vpop.eup %482  ;;  %v235_v33 = vmul.f32 1.442695, %v220_v31 }
 0x1bc   :  { %249 = vadd.xlane.f32.xlu2 %v640_v32 }
 0x1bd   :  { %484 = vpow2.f32 %v235_v33 }
 0x1c3   :  { %v643_v34 = vpop.eup %484 }
 0x1c4   :  { %251 = vadd.xlane.f32.xlu0 %v643_v34 }
 0x203   :  { %v238_v35 = vpop.xlane.xlu2 %237 }
 0x204   :  { %486 = vrcp.f32 %v238_v35  ;;  %v264_v41 = vand.u32 2147483648, %v238_v35  ;;  %v262_v43 = vand.u32 2147483647, %v238_v35  ;;  %vm258_vm2 = vweird.f32 %v238_v35 }
 0x206   :  { %v265_v49 = vor.u32 1.1754944e-38, %v264_v41  ;;  %vm263_vm4 = vcmp.eq.f32.partialorder %v262_v43, 8.507059e+37 }
 0x209   :  { %v242_v36 = vpop.xlane.xlu1 %241 }
 0x20a   :  { %v487_v37 = vpop.eup %486  ;;  %488 = vrcp.f32 %v242_v36  ;;  %v292_v54 = vand.u32 2147483647, %v242_v36  ;;  %v294_v55 = vand.u32 2147483648, %v242_v36  ;;  %vm288_vm6 = vweird.f32 %v242_v36 }
 0x20b   :  { %v254_v38 = vmul.f32 %v487_v37, %v238_v35  ;;  %v240_v39 = vpop.xlane.xlu0 %239  ;;  %vm259_vm1 = vweird.f32 %v487_v37 }
 0x20c   :  { %490 = vrcp.f32 %v240_v39  ;;  %vm260_vm3 = vmor %vm258_vm2, %vm259_vm1  ;;  %v279_v59 = vand.u32 2147483648, %v240_v39  ;;  %v277_v62 = vand.u32 2147483647, %v240_v39  ;;  %vm293_vm9 = vcmp.eq.f32.partialorder %v292_v54, 8.507059e+37 }
 0x20d   :  { %v255_v40 = vsub.f32 1.0, %v254_v38  ;;  %v295_v0 = vor.u32 1.1754944e-38, %v294_v55  ;;  %vm273_vm10 = vweird.f32 %v240_v39 }
 0x20e   :  { %v280_v5 = vor.u32 1.1754944e-38, %v279_v59  ;;  %vm278_vm12 = vcmp.eq.f32.partialorder %v277_v62, 8.507059e+37 }
 0x20f   :  { %v256_v42 = vmul.f32 %v487_v37, %v255_v40 }
 0x210   :  { %v489_v44 = vpop.eup %488 }
 0x211   :  { %v257_v45 = vadd.f32 %v487_v37, %v256_v42  ;;  %v284_v46 = vmul.f32 %v489_v44, %v242_v36  ;;  %v244_v47 = vpop.xlane.xlu2 %243  ;;  %vm289_vm5 = vweird.f32 %v489_v44 }
 0x212   :  { %v491_v48 = vpop.eup %490  ;;  %492 = vrcp.f32 %v244_v47  ;;  %vm290_vm8 = vmor %vm288_vm6, %vm289_vm5  ;;  %v309_v10 = vand.u32 2147483648, %v244_v47  ;;  %v307_v13 = vand.u32 2147483647, %v244_v47  ;;  %vm303_vm14 = vweird.f32 %v244_v47 }
 0x213   :  { %v261_v50 = vsel %vm260_vm3, %v487_v37, %v257_v45  ;;  %v285_v51 = vsub.f32 1.0, %v284_v46  ;;  %v269_v52 = vmul.f32 %v491_v48, %v240_v39  ;;  %vm274_vm7 = vweird.f32 %v491_v48 }
 0x214   :  { %v266_v53 = vsel %vm263_vm4, %v265_v49, %v261_v50  ;;  %vm275_vm11 = vmor %vm273_vm10, %vm274_vm7  ;;  %v310_v19 = vor.u32 1.1754944e-38, %v309_v10  ;;  %vm308_vm0 = vcmp.eq.f32.partialorder %v307_v13, 8.507059e+37 }
 0x215   :  { %v267_v56 = vmul.f32 %v622_v11, %v266_v53  ;;  %v286_v57 = vmul.f32 %v489_v44, %v285_v51  ;;  %v270_v58 = vsub.f32 1.0, %v269_v52 }
 0x217   :  { %373 = vst [vmem:[#allocation2] sm:$0xff] %v267_v56  ;;  %v287_v60 = vadd.f32 %v489_v44, %v286_v57  ;;  %v271_v61 = vmul.f32 %v491_v48, %v270_v58 }
 0x218   :  { %v493_v63 = vpop.eup %492 }
 0x219   :  { %v291_v1 = vsel %vm290_vm8, %v489_v44, %v287_v60  ;;  %v272_v2 = vadd.f32 %v491_v48, %v271_v61  ;;  %v299_v3 = vmul.f32 %v493_v63, %v244_v47  ;;  %vm304_vm13 = vweird.f32 %v493_v63 }
 0x21a   :  { %v296_v4 = vsel %vm293_vm9, %v295_v0, %v291_v1  ;;  %vm305_vm15 = vmor %vm303_vm14, %vm304_vm13 }
 0x21b   :  { %v297_v6 = vmul.f32 %v625_v15, %v296_v4  ;;  %v276_v7 = vsel %vm275_vm11, %v491_v48, %v272_v2  ;;  %v300_v8 = vsub.f32 1.0, %v299_v3 }
 0x21c   :  { %v281_v9 = vsel %vm278_vm12, %v280_v5, %v276_v7 }
 0x21d   :  { %375 = vst [vmem:[#allocation2 + $0x10] sm:$0xff] %v297_v6  ;;  %v282_v11 = vmul.f32 %v628_v17, %v281_v9  ;;  %v301_v12 = vmul.f32 %v493_v63, %v300_v8 }
 0x21f   :  { %374 = vst [vmem:[#allocation2 + $0x8] sm:$0xff] %v282_v11  ;;  %v302_v14 = vadd.f32 %v493_v63, %v301_v12  ;;  %v246_v16 = vpop.xlane.xlu0 %245 }
 0x220   :  { %494 = vrcp.f32 %v246_v16  ;;  %v324_v26 = vand.u32 2147483648, %v246_v16  ;;  %v322_v29 = vand.u32 2147483647, %v246_v16  ;;  %vm318_vm2 = vweird.f32 %v246_v16 }
 0x221   :  { %v306_v20 = vsel %vm305_vm15, %v493_v63, %v302_v14 }
 0x222   :  { %v311_v15 = vsel %vm308_vm0, %v310_v19, %v306_v20  ;;  %v325_v33 = vor.u32 1.1754944e-38, %v324_v26  ;;  %vm323_vm4 = vcmp.eq.f32.partialorder %v322_v29, 8.507059e+37 }
 0x223   :  { %v312_v21 = vmul.f32 %v631_v18, %v311_v15 }
 0x225   :  { %376 = vst [vmem:[#allocation2 + $0x18] sm:$0xff] %v312_v21 }
 0x226   :  { %v495_v22 = vpop.eup %494 }
 0x227   :  { %v314_v23 = vmul.f32 %v495_v22, %v246_v16  ;;  %v248_v25 = vpop.xlane.xlu1 %247  ;;  %vm319_vm1 = vweird.f32 %v495_v22 }
 0x228   :  { %496 = vrcp.f32 %v248_v25  ;;  %vm320_vm3 = vmor %vm318_vm2, %vm319_vm1  ;;  %v339_v40 = vand.u32 2147483648, %v248_v25  ;;  %v337_v42 = vand.u32 2147483647, %v248_v25  ;;  %vm333_vm6 = vweird.f32 %v248_v25 }
 0x229   :  { %v315_v17 = vsub.f32 1.0, %v314_v23 }
 0x22a   :  { %v340_v45 = vor.u32 1.1754944e-38, %v339_v40  ;;  %vm338_vm8 = vcmp.eq.f32.partialorder %v337_v42, 8.507059e+37 }
 0x22b   :  { %v316_v27 = vmul.f32 %v495_v22, %v315_v17 }
 0x22d   :  { %v317_v30 = vadd.f32 %v495_v22, %v316_v27 }
 0x22e   :  { %v497_v31 = vpop.eup %496 }
 0x22f   :  { %v321_v35 = vsel %vm320_vm3, %v495_v22, %v317_v30  ;;  %v329_v36 = vmul.f32 %v497_v31, %v248_v25  ;;  %v250_v37 = vpop.xlane.xlu2 %249  ;;  %vm334_vm5 = vweird.f32 %v497_v31 }
 0x230   :  { %v326_v18 = vsel %vm323_vm4, %v325_v33, %v321_v35  ;;  %498 = vrcp.f32 %v250_v37  ;;  %vm335_vm7 = vmor %vm333_vm6, %vm334_vm5  ;;  %v354_v51 = vand.u32 2147483648, %v250_v37  ;;  %v352_v53 = vand.u32 2147483647, %v250_v37 }
 0x231   :  { %v327_v38 = vmul.f32 %v634_v24, %v326_v18  ;;  %v330_v39 = vsub.f32 1.0, %v329_v36  ;;  %vm348_vm10 = vweird.f32 %v250_v37 }
 0x232   :  { %v355_v56 = vor.u32 1.1754944e-38, %v354_v51  ;;  %vm353_vm12 = vcmp.eq.f32.partialorder %v352_v53, 8.507059e+37 }
 0x233   :  { %377 = vst [vmem:[#allocation2 + $0x20] sm:$0xff] %v327_v38  ;;  %v331_v41 = vmul.f32 %v497_v31, %v330_v39 }
 0x235   :  { %v332_v43 = vadd.f32 %v497_v31, %v331_v41 }
 0x236   :  { %v499_v44 = vpop.eup %498 }
 0x237   :  { %v336_v46 = vsel %vm335_vm7, %v497_v31, %v332_v43  ;;  %v344_v47 = vmul.f32 %v499_v44, %v250_v37  ;;  %v252_v48 = vpop.xlane.xlu0 %251  ;;  %vm349_vm9 = vweird.f32 %v499_v44 }
 0x238   :  { %v341_v49 = vsel %vm338_vm8, %v340_v45, %v336_v46  ;;  %500 = vrcp.f32 %v252_v48  ;;  %vm350_vm11 = vmor %vm348_vm10, %vm349_vm9  ;;  %v369_v62 = vand.u32 2147483648, %v252_v48  ;;  %v367_v63 = vand.u32 2147483647, %v252_v48 }
 0x239   :  { %v342_v50 = vmul.f32 %v637_v28, %v341_v49  ;;  %v345_v24 = vsub.f32 1.0, %v344_v47  ;;  %vm363_vm14 = vweird.f32 %v252_v48 }
 0x23a   :  { %v370_v1 = vor.u32 1.1754944e-38, %v369_v62  ;;  %vm368_vm0 = vcmp.eq.f32.partialorder %v367_v63, 8.507059e+37 }
 0x23b   :  { %378 = vst [vmem:[#allocation2 + $0x28] sm:$0xff] %v342_v50  ;;  %v346_v52 = vmul.f32 %v499_v44, %v345_v24 }
 0x23d   :  { %v347_v54 = vadd.f32 %v499_v44, %v346_v52 }
 0x23e   :  { %v501_v55 = vpop.eup %500 }
 0x23f   :  { %v351_v57 = vsel %vm350_vm11, %v499_v44, %v347_v54  ;;  %v359_v58 = vmul.f32 %v501_v55, %v252_v48  ;;  %vm364_vm13 = vweird.f32 %v501_v55 }
 0x240   :  { %v356_v59 = vsel %vm353_vm12, %v355_v56, %v351_v57  ;;  %vm365_vm15 = vmor %vm363_vm14, %vm364_vm13 }
 0x241   :  { %v357_v60 = vmul.f32 %v640_v32, %v356_v59  ;;  %v360_v61 = vsub.f32 1.0, %v359_v58 }
 0x243   :  { %379 = vst [vmem:[#allocation2 + $0x30] sm:$0xff] %v357_v60  ;;  %v361_v28 = vmul.f32 %v501_v55, %v360_v61 }
 0x245   :  { %v362_v0 = vadd.f32 %v501_v55, %v361_v28 }
 0x247   :  { %v366_v2 = vsel %vm365_vm15, %v501_v55, %v362_v0 }
 0x248   :  { %v371_v3 = vsel %vm368_vm0, %v370_v1, %v366_v2 }
 0x249   :  { %v372_v32 = vmul.f32 %v643_v34, %v371_v3 }
 0x24b   :  { %380 = vst [vmem:[#allocation2 + $0x38] sm:$0xff] %v372_v32 }
 0x24c   :  { %393 = dma.vmem_to_hbm [thread:$0]  %s386_s27, 1024, %s388_s29, [#allocation3], %s529_s30, %s529_s30, %s530_s6  }
 0x24d   :  { %526 = dma.done.wait [#allocation3], 1024  }
 0x24e   :  { %527 = vsyncadd [#allocation3], 4294966272 }
 0x24f   :  { %398 = vsyncpa [#allocation3], 1 }

</bundles_post_ra>
